<compile_context>
chip_gen: v6e
topology: v6e:2x2x1
jax: 0.10.0
libtpu: 0.0.40
codegen_flags: <defaults>
</compile_context>

<pallas_src>
import functools

import jax
import jax.numpy as jnp
from jax.experimental import pallas as pl
from jax.experimental.pallas import tpu as pltpu


def _eca_kernel(x_ref, coef_ref, o_ref, *, K, pad):
    # x_ref / o_ref: (R, HW) block, R = (samples per block) * C.
    # coef_ref: (R, K) f32 — per-row tap weights with boundary zeros folded in.
    x = x_ref[...]                                                   # (R, HW)
    R = x.shape[0]

    # AdaptiveAvgPool2d(1): spatial mean per (sample, channel) row, f32 accumulate.
    m = jnp.mean(x, axis=-1, keepdims=True, dtype=jnp.float32)       # (R, 1)

    # Conv1d(1, 1, K, pad, bias=False) along channels == K shifted row adds.
    y = coef_ref[:, pad:pad + 1] * m                                 # center tap
    for t in range(K):                                               # static unroll
        off = t - pad
        if off == 0:
            continue
        if abs(off) >= R:
            shifted = jnp.zeros_like(m)
        elif off > 0:
            shifted = jnp.concatenate(
                [m[off:, :], jnp.zeros((off, 1), jnp.float32)], axis=0)
        else:
            shifted = jnp.concatenate(
                [jnp.zeros((-off, 1), jnp.float32), m[:off, :]], axis=0)
        y = y + coef_ref[:, t:t + 1] * shifted

    gate = 1.0 / (1.0 + jnp.exp(-y))                                 # sigmoid (EUP)
    # Gate every spatial position (lane broadcast), multiply in the input dtype.
    o_ref[...] = (x * gate.astype(x.dtype)).astype(o_ref.dtype)


def _pick_samples_per_block(N, C, sample_bytes, target_bytes):
    """Largest Bn <= N with Bn*sample_bytes ~ target; blocks hold whole samples and,
    when Bn < N, a sublane-aligned row count (Bn*C % 8 == 0)."""
    bn = int(max(1, min(N, target_bytes // max(1, sample_bytes))))
    if bn >= N:
        return N
    # Prefer an exact divisor of N (no ragged tail) that is sublane-aligned.
    for cand in range(bn, 0, -1):
        if N % cand == 0 and (cand * C) % 8 == 0:
            if 2 * cand >= bn:
                return cand
            break
    # Otherwise any sublane-aligned count (ragged tail rows are masked on writeback).
    for cand in range(bn, 0, -1):
        if (cand * C) % 8 == 0:
            return cand
    # Last resort: one block covering everything (always layout-legal).
    return N


def channel_attention_pallas(x, conv_weight, *, target_block_bytes=2 * 1024 * 1024):
    """x: (B, T, C, H, W); conv_weight: (1, 1, K) from nn.Conv1d(1, 1, K, bias=False)."""
    B, T, C, H, W = x.shape
    N, HW = B * T, H * W
    itemsize = jnp.dtype(x.dtype).itemsize

    x_k = x.reshape(N * C, HW)                       # pure reshape, no HBM transpose
    w = jnp.asarray(conv_weight, jnp.float32).reshape(-1)
    K = int(w.shape[0])
    pad = (K - 1) // 2

    Bn = _pick_samples_per_block(N, C, C * HW * itemsize, target_block_bytes)
    R = Bn * C
    grid = (pl.cdiv(N, Bn),)

    # coef[r, t] = w[t] if the tap's source channel (r % C) + (t - pad) is inside
    # [0, C-1] (i.e. not in the Conv1d zero padding), else 0.  Tiny host-side compute.
    cidx = jnp.arange(R) % C
    src = cidx[:, None] + (jnp.arange(K) - pad)[None, :]
    coef = jnp.where((src >= 0) & (src <= C - 1), w[None, :], 0.0).astype(jnp.float32)

    kernel = functools.partial(_eca_kernel, K=K, pad=pad)
    out_k = pl.pallas_call(
        kernel,
        out_shape=jax.ShapeDtypeStruct((N * C, HW), x.dtype),
        grid_spec=pltpu.PrefetchScalarGridSpec(
            num_scalar_prefetch=0,
            grid=grid,
            in_specs=[
                pl.BlockSpec((R, HW), lambda n: (n, 0)),
                pl.BlockSpec((R, K), lambda n: (0, 0)),
            ],
            out_specs=pl.BlockSpec((R, HW), lambda n: (n, 0)),
        ),
        compiler_params=pltpu.CompilerParams(
            dimension_semantics=("parallel",),        # shards grid across TCs on v7x
            vmem_limit_bytes=48 * 1024 * 1024,        # safe on v5e/v6e/v7x
        ),
        cost_estimate=pl.CostEstimate(
            flops=2 * N * C * HW + 2 * K * N * C,
            transcendentals=N * C,
            bytes_accessed=2 * N * C * HW * itemsize,
        ),
    )(x_k, coef)

    return out_k.reshape(B, T, C, H, W)


def channel_attention_ref(x, conv_weight):
    """Pure-JAX reference matching the PyTorch module."""
    B, T, C, H, W = x.shape
    xf = x.reshape(B * T, C, H * W)
    m = jnp.mean(xf.astype(jnp.float32), axis=-1)              # (N, C)
    w = jnp.asarray(conv_weight, jnp.float32).reshape(-1)      # (K,)
    K = int(w.shape[0])
    pad = (K - 1) // 2
    mp = jnp.pad(m, ((0, 0), (pad, pad)))
    y = sum(w[t] * mp[:, t:t + C] for t in range(K))
    a = jax.nn.sigmoid(y)                                      # (N, C)
    out = xf * a[:, :, None].astype(xf.dtype)
    return out.reshape(B, T, C, H, W)


if __name__ == "__main__":
    key = jax.random.PRNGKey(0)
    kx, kw = jax.random.split(key)

    B, T, C, H, W = 2, 2, 8, 16, 16
    x = jax.random.normal(kx, (B, T, C, H, W), dtype=jnp.float32)
    # nn.Conv1d(1, 1, kernel_size=3, bias=False) weight shape: (1, 1, 3)
    conv_weight = jax.random.uniform(kw, (1, 1, 3), dtype=jnp.float32,
                                     minval=-0.5, maxval=0.5)

    out = jax.block_until_ready(channel_attention_pallas(x, conv_weight))
    ref = channel_attention_ref(x, conv_weight)

    assert out.shape == (B, T, C, H, W)
    assert jnp.allclose(out, ref, atol=1e-4, rtol=1e-4), (
        "mismatch vs reference: max abs err = %g"
        % float(jnp.max(jnp.abs(out - ref))))

    print("KERNEL_OK")
</pallas_src>

<mosaic_0001>
module attributes {stable_mosaic.version = 11 : i64} {
  func.func @_eca_kernel(%arg0: i32, %arg1: memref<32x256xf32, #tpu.memory_space<vmem>>, %arg2: memref<32x3xf32, #tpu.memory_space<vmem>>, %arg3: memref<32x256xf32, #tpu.memory_space<vmem>>) attributes {dimension_semantics = [#tpu.dimension_semantics<parallel>], iteration_bounds = array<i64: 1>, scalar_prefetch = 0 : i64, scratch_operands = 0 : i64, tpu.core_type = #tpu.core_type<tc>, window_params = [{transform_indices = @transform_0, window_bounds = array<i64: 32, 256>}, {pipeline_mode = #tpu.pipeline_mode<synchronous>, transform_indices = @transform_1, window_bounds = array<i64: 32, 3>}, {transform_indices = @transform_2, window_bounds = array<i64: 32, 256>}]} {
    %c0 = arith.constant 0 : index
    %c0_0 = arith.constant 0 : index
    %0 = vector.load %arg1[%c0, %c0_0] : memref<32x256xf32, #tpu.memory_space<vmem>>, vector<32x256xf32>
    %cst = arith.constant dense<0.000000e+00> : vector<32xf32>
    %1 = vector.multi_reduction <add>, %0, %cst [1] : vector<32x256xf32> to vector<32xf32>
    %2 = vector.shape_cast %1 : vector<32xf32> to vector<32x1xf32>
    %cst_1 = arith.constant 2.560000e+02 : f32
    %3 = vector.broadcast %cst_1 : f32 to vector<32x1xf32>
    %4 = arith.divf %2, %3 : vector<32x1xf32>
    %c0_2 = arith.constant 0 : index
    %c1 = arith.constant 1 : index
    %5 = vector.load %arg2[%c0_2, %c1] : memref<32x3xf32, #tpu.memory_space<vmem>>, vector<32x1xf32>
    %6 = arith.mulf %5, %4 : vector<32x1xf32>
    %cst_3 = arith.constant 0.000000e+00 : f32
    %7 = vector.broadcast %cst_3 : f32 to vector<1x1xf32>
    %8 = vector.extract_strided_slice %4 {offsets = [0, 0], sizes = [31, 1], strides = [1, 1]} : vector<32x1xf32> to vector<31x1xf32>
    %9 = tpu.concatenate %7, %8 in 0 : vector<1x1xf32>, vector<31x1xf32> -> vector<32x1xf32>
    %c0_4 = arith.constant 0 : index
    %c0_5 = arith.constant 0 : index
    %10 = vector.load %arg2[%c0_4, %c0_5] : memref<32x3xf32, #tpu.memory_space<vmem>>, vector<32x1xf32>
    %11 = arith.mulf %10, %9 : vector<32x1xf32>
    %12 = arith.addf %6, %11 : vector<32x1xf32>
    %13 = vector.extract_strided_slice %4 {offsets = [1, 0], sizes = [31, 1], strides = [1, 1]} : vector<32x1xf32> to vector<31x1xf32>
    %cst_6 = arith.constant 0.000000e+00 : f32
    %14 = vector.broadcast %cst_6 : f32 to vector<1x1xf32>
    %15 = tpu.concatenate %13, %14 in 0 : vector<31x1xf32>, vector<1x1xf32> -> vector<32x1xf32>
    %c0_7 = arith.constant 0 : index
    %c2 = arith.constant 2 : index
    %16 = vector.load %arg2[%c0_7, %c2] : memref<32x3xf32, #tpu.memory_space<vmem>>, vector<32x1xf32>
    %17 = arith.mulf %16, %15 : vector<32x1xf32>
    %18 = arith.addf %12, %17 : vector<32x1xf32>
    %cst_8 = arith.constant 0.000000e+00 : f32
    %19 = vector.broadcast %cst_8 : f32 to vector<32x1xf32>
    %20 = arith.subf %19, %18 : vector<32x1xf32>
    %21 = math.exp %20 : vector<32x1xf32>
    %cst_9 = arith.constant 1.000000e+00 : f32
    %22 = vector.broadcast %cst_9 : f32 to vector<32x1xf32>
    %23 = arith.addf %22, %21 : vector<32x1xf32>
    %cst_10 = arith.constant 1.000000e+00 : f32
    %24 = vector.broadcast %cst_10 : f32 to vector<32x1xf32>
    %25 = arith.divf %24, %23 : vector<32x1xf32>
    %26 = vector.broadcast %25 : vector<32x1xf32> to vector<32x256xf32>
    %27 = arith.mulf %0, %26 : vector<32x256xf32>
    %c0_11 = arith.constant 0 : index
    %c0_12 = arith.constant 0 : index
    %28 = vector.load %arg3[%c0_11, %c0_12] : memref<32x256xf32, #tpu.memory_space<vmem>>, vector<32x256xf32>
    tpu.vector_store %arg3[%c0_11, %c0_12], %27 {strides = array<i32>} : memref<32x256xf32, #tpu.memory_space<vmem>>, vector<32x256xf32>,
    return
  }
  func.func @transform_0(%arg0: i32) -> (i32, i32) {
    %c0_i32 = arith.constant 0 : i32
    %c0_i32_0 = arith.constant 0 : i32
    return %arg0, %c0_i32 : i32, i32
  }
  func.func @transform_1(%arg0: i32) -> (i32, i32) {
    %c0_i32 = arith.constant 0 : i32
    %c0_i32_0 = arith.constant 0 : i32
    %c0_i32_1 = arith.constant 0 : i32
    return %c0_i32, %c0_i32_0 : i32, i32
  }
  func.func @transform_2(%arg0: i32) -> (i32, i32) {
    %c0_i32 = arith.constant 0 : i32
    %c0_i32_0 = arith.constant 0 : i32
    return %arg0, %c0_i32 : i32, i32
  }
}

</mosaic_0001>

<bundles_post_ra>
// kernel: tpu_custom_call.1
= control target key start
LH: loop header
LB: loop body
LE: loop exit
PB: predicated region body
PF: predicated region fallthrough
CT: control target
= control target key end

     0   :  { %7 = vsyncpa [#allocation3], 0  ;;  %s391_s0 = inlined_call_operand.hbm [shape: f32[32,256], index: 0, kind: input, shape index: {}]   ;;  %s392_s1 = inlined_call_operand.vmem [shape: f32[32,3], index: 1, kind: input, shape index: {}]   ;;  %s393_s2 = inlined_call_operand.hbm [shape: f32[32,256], index: 2, kind: output, shape index: {}]  }
   0x1   :  { %8 = vsyncpa [#allocation4], 0  ;;  %s294_s9 = smov [#allocation2]  }
   0x2   :  { %s14_s10 = sshll.u32 %s294_s9, 4  ;;  %s15_s10 = int_to_ptr.vmem [resolvable:$true] %s14_s10 }
   0x3   :  { %s258_s11 = scalar_lea.vmem %s15_s10, 1024  ;;  %p263_p1 = scmp.lt.s32.totalorder %s15_s10, %s15_s10 }
   0x4   :  { %p259_p0 = scmp.ne.s32.totalorder %s15_s10, %s258_s11  ;;  %p264_p2 = scmp.lt.s32.totalorder %s258_s11, %s258_s11 }
   0x6   :  { %p265_p3 = por %p264_p2, %p263_p1 }
   0x8   :  { %p266_p4 = pnand %p265_p3, %p259_p0 }
   0xa   :  { %269 = shalt.err (!%p266_p4)
}
   0xb   :  { %s295_s12 = smov 256   ;;  %s296_s13 = smov 16  }
   0xc   :  { %20 = dma.hbm_to_vmem [thread:$0]  %s391_s0, 1024, %s15_s10, [#allocation3], %s295_s12, %s295_s12, %s296_s13  }
   0xd   :  { %290 = dma.done.wait [#allocation3], 1024  }
   0xe   :  { %291 = vsyncadd [#allocation3], 4294966272  ;;  %v323_v0 = vld [vmem:[#allocation2 + $0x20] sm:$0xff]  ;;  %v325_v1 = vld [vmem:[#allocation2 + $0x28] sm:$0xff]  ;;  %vm63_vm0 = vcmask 1040384   ;;  %vm100_vm1 = vcmask 1046528  }
   0xf   :  { %v327_v2 = vld [vmem:[#allocation2] sm:$0xff]  ;;  %v40_v3 = vadd.f32 %v325_v1, %v323_v0  ;;  %v331_v4 = vld [vmem:[#allocation2 + $0x8] sm:$0xff]  ;;  %v333_v5 = vld [vmem:[#allocation2 + $0x30] sm:$0xff]  ;;  %s297_s0 = smov 2   ;;  %s298_s18 = smov 1   ;;  %v300_v52 = vmov 1  }
  0x10   :  { %v335_v6 = vld [vmem:[#allocation2 + $0x38] sm:$0xff]  ;;  %v34_v7 = vadd.f32 %v331_v4, %v327_v2  ;;  %v339_v8 = vld [vmem:[#allocation2 + $0x10] sm:$0xff]  ;;  %v51_v30 = vld [vmem:[%s392_s1] sm:$0xff]  ;;  %s299_s25 = smov 127   ;;  %233 = vset.pattern.permute.xlu1 %v300_v52  ;;  %232 = vset.pattern.permute.xlu0 %v300_v52 }
  0x11   :  { %v341_v9 = vld [vmem:[#allocation2 + $0x18] sm:$0xff]  ;;  %41 = vadd.xlane.f32.xlu1 %v40_v3  ;;  %v43_v10 = vadd.f32 %v335_v6, %v333_v5  ;;  %v53_v34 = vld [vmem:[%s392_s1 + $0x10] sm:$0xff]  ;;  %v52_v39 = vld [vmem:[%s392_s1 + $0x8] sm:$0xff] }
  0x12   :  { %35 = vadd.xlane.f32.xlu0 %v34_v7  ;;  %v37_v11 = vadd.f32 %v341_v9, %v339_v8  ;;  %v54_v41 = vld [vmem:[%s392_s1 + $0x18] sm:$0xff]  ;;  %s301_s1 = smov [#allocation5]  }
  0x13   :  { %s212_s26 = sshll.u32 %s301_s1, 4  ;;  %s213_s26 = int_to_ptr.vmem [resolvable:$true] %s212_s26 }
  0x14   :  { %s270_s27 = scalar_lea.vmem %s213_s26, 1024  ;;  %p275_p6 = scmp.lt.s32.totalorder %s213_s26, %s213_s26 }
  0x15   :  { %44 = vadd.xlane.f32.xlu1 %v43_v10  ;;  %p271_p5 = scmp.ne.s32.totalorder %s213_s26, %s270_s27  ;;  %p276_p7 = scmp.lt.s32.totalorder %s270_s27, %s270_s27 }
  0x16   :  { %38 = vadd.xlane.f32.xlu0 %v37_v11 }
  0x17   :  { %p277_p8 = por %p276_p7, %p275_p6 }
  0x19   :  { %p278_p9 = pnand %p277_p8, %p271_p5 }
  0x9a   :  { %v42_v12 = vpop.xlane.xlu1 %41 }
  0x9b   :  { %v36_v13 = vpop.xlane.xlu0 %35  ;;  %v347_v14 = vmul.f32 0.00390625, %v42_v12 }
  0x9c   :  { %v47_v15 = vmul.f32 0.00390625, %v36_v13 }
  0x9d   :  { %v104_v19 = vrot.slane %v347_v14, 1  ;;  %v67_v24 = vrot.slane %v347_v14, 7  ;;  %v57_v63 = vmul.f32 %v53_v34, %v347_v14 }
  0x9e   :  { %v45_v16 = vpop.xlane.xlu1 %44  ;;  %v64_v17 = vrot.slane %v47_v15, 7  ;;  %v101_v22 = vrot.slane %v47_v15, 1  ;;  %v55_v57 = vmul.f32 %v51_v30, %v47_v15 }
  0x9f   :  { %v39_v18 = vpop.xlane.xlu0 %38  ;;  %v350_v20 = vmul.f32 0.00390625, %v45_v16 }
  0xa0   :  { %v48_v21 = vmul.f32 0.00390625, %v39_v18  ;;  %v75_v25 = vsel %vm63_vm0, 0.0, %v64_v17 }
  0xa1   :  { %v106_v26 = vrot.slane %v350_v20, 1  ;;  %v76_v31 = vmul.f32 %v75_v25, %v51_v30  ;;  %v69_v36 = vrot.slane %v350_v20, 7  ;;  %v58_v16 = vmul.f32 %v54_v41, %v350_v20 }
  0xa2   :  { %v102_v23 = vrot.slane %v48_v21, 1  ;;  %v65_v27 = vrot.slane %v48_v21, 7  ;;  %v56_v58 = vmul.f32 %v52_v39, %v48_v21 }
  0xa3   :  { %v107_v32 = vsel %vm100_vm1, %v104_v19, %v106_v26  ;;  %v109_v37 = vsel %vm100_vm1, %v106_v26, 0.0  ;;  %v70_v42 = vsel %vm63_vm0, %v67_v24, %v69_v36 }
  0xa4   :  { %v105_v28 = vsel %vm100_vm1, %v102_v23, %v104_v19  ;;  %v103_v29 = vsel %vm100_vm1, %v101_v22, %v102_v23  ;;  %v68_v33 = vsel %vm63_vm0, %v65_v27, %v67_v24  ;;  %v66_v38 = vsel %vm63_vm0, %v64_v17, %v65_v27 }
  0xa5   :  { %113 = vrot.lane.b32.xlu1 %v105_v28, %s297_s0  ;;  %111 = vrot.lane.b32.xlu0 %v103_v29, %s297_s0  ;;  %v78_v35 = vmul.f32 %v68_v33, %v53_v34  ;;  %v77_v40 = vmul.f32 %v66_v38, %v52_v39  ;;  %v79_v43 = vmul.f32 %v70_v42, %v54_v41 }
  0xa9   :  { %115 = vrot.lane.b32.xlu1 %v107_v32, %s297_s0  ;;  %84 = vrot.lane.b32.xlu0 %v76_v31, %s298_s18 }
  0xad   :  { %117 = vrot.lane.b32.xlu1 %v109_v37, %s297_s0  ;;  %88 = vrot.lane.b32.xlu0 %v78_v35, %s298_s18 }
  0xb1   :  { %86 = vrot.lane.b32.xlu1 %v77_v40, %s298_s18 }
  0xb5   :  { %90 = vrot.lane.b32.xlu1 %v79_v43, %s298_s18 }
 0x117   :  { %v114_v44 = vpop.permute.xlu1 %113  ;;  %v112_v45 = vpop.permute.xlu0 %111 }
 0x118   :  { %v124_v46 = vmul.f32 %v114_v44, %v52_v39  ;;  %v123_v47 = vmul.f32 %v112_v45, %v51_v30 }
 0x11a   :  { %131 = vrot.lane.b32.xlu0 %v123_v47, %s299_s25  ;;  %133 = vrot.lane.b32.xlu1 %v124_v46, %s299_s25 }
 0x11b   :  { %v116_v48 = vpop.permute.xlu1 %115  ;;  %v85_v53 = vpop.permute.xlu0 %84 }
 0x11c   :  { %v125_v49 = vmul.f32 %v116_v48, %v53_v34  ;;  %v96_v59 = vadd.f32 %v85_v53, %v55_v57 }
 0x11e   :  { %135 = vrot.lane.b32.xlu0 %v125_v49, %s299_s25 }
 0x11f   :  { %v118_v50 = vpop.permute.xlu1 %117  ;;  %v89_v55 = vpop.permute.xlu0 %88 }
 0x120   :  { %v126_v51 = vmul.f32 %v118_v50, %v54_v41  ;;  %v98_v10 = vadd.f32 %v89_v55, %v57_v63 }
 0x122   :  { %137 = vrot.lane.b32.xlu1 %v126_v51, %s299_s25 }
 0x123   :  { %v87_v54 = vpop.permute.xlu1 %86 }
 0x124   :  { %v97_v60 = vadd.f32 %v87_v54, %v56_v58 }
 0x127   :  { %v91_v56 = vpop.permute.xlu1 %90 }
 0x128   :  { %v99_v22 = vadd.f32 %v91_v56, %v58_v16 }
 0x18c   :  { %v132_v61 = vpop.permute.xlu0 %131  ;;  %v134_v62 = vpop.permute.xlu1 %133 }
 0x18d   :  { %v143_v3 = vadd.f32 %v132_v61, %v96_v59  ;;  %v144_v7 = vadd.f32 %v134_v62, %v97_v60 }
 0x18f   :  { %v147_v11 = vsub.f32 0.0, %v143_v3  ;;  %v148_v12 = vsub.f32 0.0, %v144_v7 }
 0x190   :  { %v136_v13 = vpop.permute.xlu0 %135 }
 0x191   :  { %v151_v17 = vmul.f32 1.442695, %v147_v11  ;;  %v153_v18 = vmul.f32 1.442695, %v148_v12  ;;  %v145_v19 = vadd.f32 %v136_v13, %v98_v10 }
 0x193   :  { %234 = vpow2.f32 %v151_v17  ;;  %v149_v15 = vsub.f32 0.0, %v145_v19 }
 0x194   :  { %236 = vpow2.f32 %v153_v18  ;;  %v138_v21 = vpop.permute.xlu1 %137 }
 0x195   :  { %v155_v23 = vmul.f32 1.442695, %v149_v15  ;;  %v146_v24 = vadd.f32 %v138_v21, %v99_v22 }
 0x197   :  { %238 = vpow2.f32 %v155_v23  ;;  %v150_v14 = vsub.f32 0.0, %v146_v24 }
 0x199   :  { %v157_v25 = vmul.f32 1.442695, %v150_v14 }
 0x19b   :  { %240 = vpow2.f32 %v157_v25 }
 0x1a0   :  { %v235_v26 = vpop.eup %234 }
 0x1a1   :  { %v237_v27 = vpop.eup %236  ;;  %v159_v28 = vadd.f32 1.0, %v235_v26 }
 0x1a2   :  { %v160_v29 = vadd.f32 1.0, %v237_v27 }
 0x1a3   :  { %242 = vrcp.f32 %v159_v28 }
 0x1a4   :  { %v239_v20 = vpop.eup %238  ;;  %244 = vrcp.f32 %v160_v29 }
 0x1a5   :  { %v161_v30 = vadd.f32 1.0, %v239_v20 }
 0x1a7   :  { %246 = vrcp.f32 %v161_v30 }
 0x1a8   :  { %v241_v31 = vpop.eup %240 }
 0x1a9   :  { %v162_v32 = vadd.f32 1.0, %v241_v31 }
 0x1ab   :  { %248 = vrcp.f32 %v162_v32 }
 0x1b0   :  { %v243_v33 = vpop.eup %242 }
 0x1b1   :  { %v245_v34 = vpop.eup %244  ;;  %173 = vperm.xlu0 %232, %v243_v33  }
 0x1b2   :  { %178 = vperm.xlu1 %233, %v245_v34  }
 0x1b4   :  { %v247_v35 = vpop.eup %246 }
 0x1b6   :  { %183 = vperm.xlu1 %233, %v247_v35  }
 0x1b8   :  { %v249_v36 = vpop.eup %248 }
 0x1b9   :  { %188 = vperm.xlu0 %232, %v249_v36  }
 0x22c   :  { %v174_v37 = vpop.permute.xlu0 %173 }
 0x22d   :  { %v191_v38 = vmul.f32 %v174_v37, %v327_v2  ;;  %v192_v39 = vmul.f32 %v174_v37, %v331_v4  ;;  %v179_v40 = vpop.permute.xlu1 %178 }
 0x22e   :  { %v193_v41 = vmul.f32 %v179_v40, %v339_v8  ;;  %v194_v42 = vmul.f32 %v179_v40, %v341_v9 }
 0x22f   :  { %199 = vst [vmem:[#allocation5] sm:$0xff] %v191_v38  ;;  %200 = vst [vmem:[#allocation5 + $0x8] sm:$0xff] %v192_v39 }
 0x230   :  { %201 = vst [vmem:[#allocation5 + $0x10] sm:$0xff] %v193_v41  ;;  %202 = vst [vmem:[#allocation5 + $0x18] sm:$0xff] %v194_v42 }
 0x231   :  { %v184_v43 = vpop.permute.xlu1 %183 }
 0x232   :  { %v195_v44 = vmul.f32 %v184_v43, %v323_v0  ;;  %v196_v45 = vmul.f32 %v184_v43, %v325_v1 }
 0x234   :  { %203 = vst [vmem:[#allocation5 + $0x20] sm:$0xff] %v195_v44  ;;  %204 = vst [vmem:[#allocation5 + $0x28] sm:$0xff] %v196_v45  ;;  %v189_v2 = vpop.permute.xlu0 %188 }
 0x235   :  { %v197_v4 = vmul.f32 %v189_v2, %v333_v5  ;;  %v198_v8 = vmul.f32 %v189_v2, %v335_v6 }
 0x237   :  { %205 = vst [vmem:[#allocation5 + $0x30] sm:$0xff] %v197_v4  ;;  %206 = vst [vmem:[#allocation5 + $0x38] sm:$0xff] %v198_v8 }
 0x238   :  { %281 = shalt.err (!%p278_p9)
}
 0x239   :  { %218 = dma.vmem_to_hbm [thread:$0]  %s213_s26, 1024, %s393_s2, [#allocation4], %s295_s12, %s295_s12, %s296_s13  }
 0x23a   :  { %292 = dma.done.wait [#allocation4], 1024  }
 0x23b   :  { %293 = vsyncadd [#allocation4], 4294966272 }
 0x23c   :  { %222 = vsyncpa [#allocation3], 1 }
 0x23d   :  { %223 = vsyncpa [#allocation4], 1 }

</bundles_post_ra>
